<compile_context>
chip_gen: v7x
topology: tpu7x:2x2x1
jax: 0.10.0
libtpu: 0.0.40
codegen_flags: <defaults>
</compile_context>

<pallas_src>
import math

import jax
import jax.numpy as jnp
from jax.experimental import pallas as pl
from jax.experimental.pallas import tpu as pltpu

_GATE_LANES = 128  # per-gate lane width: z gate in lanes [0,128), candidate in [128,256)


# ----------------------------------------------------------------------------
# Wrapper-side weight packing (pure data prep; done once per parameter set).
# ----------------------------------------------------------------------------
def _pack_weights(weights, bias, state_size, input_features):
    """Split the PyTorch-layout (2S, S+I) weights / (2S,) bias into
    pre-transposed, lane-padded slabs:
      w_h : (128, 256)  rows = old_h features (rows >= S are zero)
      w_x : (I, 256)    rows = input features
      b   : (256,)
    z gate occupies lanes [0, S), candidate gate lanes [128, 128+S); all other
    lanes are zero, so padded activations contribute nothing.
    """
    S, I, L = state_size, input_features, _GATE_LANES
    f32 = jnp.float32
    w_z = weights[:S].astype(f32)        # (S, S+I)  -> z gate rows
    w_c = weights[S:].astype(f32)        # (S, S+I)  -> candidate gate rows

    w_h = jnp.zeros((L, 2 * L), f32)
    w_h = w_h.at[:S, :S].set(w_z[:, :S].T)
    w_h = w_h.at[:S, L:L + S].set(w_c[:, :S].T)

    w_x = jnp.zeros((I, 2 * L), f32)
    w_x = w_x.at[:, :S].set(w_z[:, S:].T)
    w_x = w_x.at[:, L:L + S].set(w_c[:, S:].T)

    b = jnp.zeros((2 * L,), f32)
    b = b.at[:S].set(bias[:S].astype(f32))
    b = b.at[L:L + S].set(bias[S:].astype(f32))
    return w_h, w_x, b


# ----------------------------------------------------------------------------
# Single-step kernel (exact GRU_minimal.forward semantics).
# ----------------------------------------------------------------------------
def _gru_step_kernel(xh_ref, w_ref, out_ref):
    S = out_ref.shape[1]
    xh = xh_ref[...].astype(jnp.float32)                      # (B, 128) = [h|x|1|0]
    # One MXU push: 128-deep contraction, 256 output lanes (both gates + bias).
    gates = jnp.dot(xh, w_ref[...],
                    preferred_element_type=jnp.float32)       # (B, 256)
    z = jax.nn.sigmoid(gates[:, :S])                          # EUP
    c = jnp.tanh(gates[:, _GATE_LANES:_GATE_LANES + S])       # EUP
    h = xh[:, :S]
    # new_h = h*z + c*(1-z) == c + z*(h - c)
    out_ref[...] = (c + z * (h - c)).astype(out_ref.dtype)


def gru_minimal_forward(x, h, weights, bias):
    """x: (B, I), h: (B, S), weights: (2S, S+I) [PyTorch F.linear layout],
    bias: (2S,)  ->  new_h: (B, S)."""
    B, I = x.shape
    S = h.shape[1]
    L = _GATE_LANES
    assert S + I + 1 <= L, "grow the contraction slab for larger cells"
    f32 = jnp.float32

    w_h, w_x, b = _pack_weights(weights, bias, S, I)
    # One (128, 256) slab: rows [W_h (S) | W_x (I) | bias (1) | 0-pad].
    w_aug = w_h.at[S:S + I, :].set(w_x).at[S + I, :].set(b)

    # Packed activation block [h | x | 1 | 0-pad] -> (B, 128): one input DMA,
    # and the in-kernel contraction dim is a clean single vreg width.
    xh = jnp.zeros((B, L), f32)
    xh = xh.at[:, :S].set(h.astype(f32))
    xh = xh.at[:, S:S + I].set(x.astype(f32))
    xh = xh.at[:, S + I].set(1.0)

    vmem = pl.BlockSpec(memory_space=pltpu.VMEM)
    return pl.pallas_call(
        _gru_step_kernel,
        out_shape=jax.ShapeDtypeStruct((B, S), x.dtype),
        in_specs=[vmem, vmem],
        out_specs=vmem,
    )(xh, w_aug)


# ----------------------------------------------------------------------------
# Fused sequence kernel: one pallas_call over grid=(T,), weights resident,
# h carried in VMEM scratch, x-projection hoisted out of the recurrence.
# ----------------------------------------------------------------------------
def _gru_seq_kernel(xproj_ref, wh_ref, h0_ref, out_ref, h_scr):
    t = pl.program_id(0)

    @pl.when(t == 0)
    def _():
        h_scr[...] = h0_ref[...]

    S = out_ref.shape[-1]
    h = h_scr[...]                                             # (B, 128)
    # One MXU push per step: h @ [W_hz | W_hc]; the x-side projection + bias
    # were precomputed in one large matmul and stream in via xproj_ref.
    gates = (jnp.dot(h, wh_ref[...], preferred_element_type=jnp.float32)
             + xproj_ref[0])                                   # (B, 256)
    z = jax.nn.sigmoid(gates[:, :_GATE_LANES])
    c = jnp.tanh(gates[:, _GATE_LANES:])
    h_new = c + z * (h - c)                                    # (B, 128)
    h_scr[...] = h_new
    out_ref[0] = h_new[:, :S].astype(out_ref.dtype)


def gru_minimal_sequence(xs, h0, weights, bias):
    """Apply the GRU_minimal cell over a sequence in ONE pallas_call.
    xs: (T, B, I), h0: (B, S)  ->  hidden states for every step: (T, B, S)."""
    T, B, I = xs.shape
    S = h0.shape[1]
    L = _GATE_LANES
    f32 = jnp.float32

    w_h, w_x, b = _pack_weights(weights, bias, S, I)

    # Hoisted input projection: one (T*B, I) @ (I, 256) matmul + bias for all
    # timesteps (full f32 precision so it matches the f32 reference).
    x_proj = (jnp.dot(xs.reshape(T * B, I).astype(f32), w_x,
                      precision=jax.lax.Precision.HIGHEST)
              + b).reshape(T, B, 2 * L)

    h0_pad = jnp.zeros((B, L), f32).at[:, :S].set(h0.astype(f32))

    grid_spec = pltpu.PrefetchScalarGridSpec(
        num_scalar_prefetch=0,
        grid=(T,),
        in_specs=[
            # x(t) projection: streamed, one (1, B, 256) block per grid step.
            pl.BlockSpec((1, B, 2 * L), lambda t: (t, 0, 0)),
            # Recurrent weights + initial state: block index never changes ->
            # DMA'd once and resident in VMEM for the whole sequence.
            pl.BlockSpec((L, 2 * L), lambda t: (0, 0)),
            pl.BlockSpec((B, L), lambda t: (0, 0)),
        ],
        out_specs=pl.BlockSpec((1, B, S), lambda t: (t, 0, 0)),
        scratch_shapes=[pltpu.VMEM((B, L), f32)],   # carried hidden state
    )
    return pl.pallas_call(
        _gru_seq_kernel,
        out_shape=jax.ShapeDtypeStruct((T, B, S), xs.dtype),
        grid_spec=grid_spec,
        compiler_params=pltpu.CompilerParams(
            # The time axis is a true recurrence -> sequential ("arbitrary").
            # TODO(synk): on v7x add an independent batch-block grid axis
            # marked "parallel" to shard work across the 2 TensorCores.
            dimension_semantics=("arbitrary",)),
    )(x_proj, w_h, h0_pad)


# ----------------------------------------------------------------------------
# Pure-JAX references (mirror the PyTorch module).
# ----------------------------------------------------------------------------
def reference_forward(x, h, weights, bias):
    X = jnp.concatenate([h, x], axis=1)
    gates = jnp.dot(X, weights.T, precision=jax.lax.Precision.HIGHEST) + bias
    S = h.shape[1]
    z = jax.nn.sigmoid(gates[:, :S])
    c = jnp.tanh(gates[:, S:])
    return h * z + c * (1.0 - z)


def reference_sequence(xs, h0, weights, bias):
    h = h0
    outs = []
    for t in range(xs.shape[0]):
        h = reference_forward(xs[t], h, weights, bias)
        outs.append(h)
    return jnp.stack(outs, axis=0)


if __name__ == "__main__":
    batch = 8
    input_features = 16
    state_size = 32
    seq_len = 8

    key = jax.random.PRNGKey(0)
    k_x, k_h, k_w, k_b, k_xs = jax.random.split(key, 5)

    # Deterministic parameter init mirroring reset_parameters():
    # uniform(-stdv, +stdv) with stdv = 1/sqrt(state_size)
    stdv = 1.0 / math.sqrt(state_size)
    weights = jax.random.uniform(
        k_w, (2 * state_size, input_features + state_size),
        minval=-stdv, maxval=stdv, dtype=jnp.float32)
    bias = jax.random.uniform(
        k_b, (2 * state_size,), minval=-stdv, maxval=stdv, dtype=jnp.float32)

    x = jax.random.normal(k_x, (batch, input_features), dtype=jnp.float32)
    h = jax.random.normal(k_h, (batch, state_size), dtype=jnp.float32)

    # 1) Single-step kernel == module forward.
    new_h = jax.block_until_ready(gru_minimal_forward(x, h, weights, bias))
    ref = reference_forward(x, h, weights, bias)
    assert new_h.shape == (batch, state_size)
    assert jnp.allclose(new_h, ref, atol=1e-5, rtol=1e-5)

    # 2) Fused-sequence kernel == module stepped over time.
    xs = jax.random.normal(
        k_xs, (seq_len, batch, input_features), dtype=jnp.float32)
    hs = jax.block_until_ready(gru_minimal_sequence(xs, h, weights, bias))
    ref_hs = reference_sequence(xs, h, weights, bias)
    assert hs.shape == (seq_len, batch, state_size)
    assert jnp.allclose(hs, ref_hs, atol=1e-4, rtol=1e-4)

    print("KERNEL_OK")
</pallas_src>

<mosaic_0001>
module attributes {stable_mosaic.version = 11 : i64} {
  func.func @_gru_step_kernel(%arg0: memref<8x128xf32, #tpu.memory_space<vmem>>, %arg1: memref<128x256xf32, #tpu.memory_space<vmem>>, %arg2: memref<8x32xf32, #tpu.memory_space<vmem>>) attributes {dimension_semantics = [], scalar_prefetch = 0 : i64, scratch_operands = 0 : i64, tpu.core_type = #tpu.core_type<tc>} {
    %c0 = arith.constant 0 : index
    %c0_0 = arith.constant 0 : index
    %0 = vector.load %arg0[%c0, %c0_0] : memref<8x128xf32, #tpu.memory_space<vmem>>, vector<8x128xf32>
    %c0_1 = arith.constant 0 : index
    %c0_2 = arith.constant 0 : index
    %1 = vector.load %arg1[%c0_1, %c0_2] : memref<128x256xf32, #tpu.memory_space<vmem>>, vector<128x256xf32>
    %cst = arith.constant dense<0.000000e+00> : vector<8x256xf32>
    %2 = tpu.matmul %0, %1, %cst {dimension_numbers = #tpu.dot_dimension_numbers<[1], [0], [0], [1], [0, 0, 1, 1], [], []>} : vector<8x128xf32>, vector<128x256xf32>, vector<8x256xf32> -> vector<8x256xf32>
    %3 = vector.extract_strided_slice %2 {offsets = [0, 0], sizes = [8, 32], strides = [1, 1]} : vector<8x256xf32> to vector<8x32xf32>
    %4 = arith.negf %3 : vector<8x32xf32>
    %5 = math.exp %4 : vector<8x32xf32>
    %cst_3 = arith.constant 1.000000e+00 : f32
    %6 = vector.broadcast %cst_3 : f32 to vector<8x32xf32>
    %7 = arith.addf %6, %5 : vector<8x32xf32>
    %8 = arith.divf %6, %7 : vector<8x32xf32>
    %9 = vector.extract_strided_slice %2 {offsets = [0, 128], sizes = [8, 32], strides = [1, 1]} : vector<8x256xf32> to vector<8x32xf32>
    %10 = math.tanh %9 : vector<8x32xf32>
    %11 = vector.extract_strided_slice %0 {offsets = [0, 0], sizes = [8, 32], strides = [1, 1]} : vector<8x128xf32> to vector<8x32xf32>
    %12 = arith.subf %11, %10 : vector<8x32xf32>
    %13 = arith.mulf %8, %12 : vector<8x32xf32>
    %14 = arith.addf %10, %13 : vector<8x32xf32>
    %c0_4 = arith.constant 0 : index
    %c0_5 = arith.constant 0 : index
    %15 = vector.load %arg2[%c0_4, %c0_5] : memref<8x32xf32, #tpu.memory_space<vmem>>, vector<8x32xf32>
    tpu.vector_store %arg2[%c0_4, %c0_5], %14 {strides = array<i32>} : memref<8x32xf32, #tpu.memory_space<vmem>>, vector<8x32xf32>,
    return
  }
}

</mosaic_0001>

<bundles_post_ra>
// kernel: tpu_custom_call.1
= control target key start
LH: loop header
LB: loop body
LE: loop exit
PB: predicated region body
PF: predicated region fallthrough
CT: control target
= control target key end

     0   :  { %7 = vsyncpa [#allocation3], 0  ;;  %s351_s0 = inlined_call_operand.hbm [shape: f32[8,128], index: 0, kind: input, shape index: {}]   ;;  %s352_s1 = inlined_call_operand.hbm [shape: f32[128,256], index: 1, kind: input, shape index: {}]   ;;  %s353_s2 = inlined_call_operand.hbm [shape: f32[8,32], index: 2, kind: output, shape index: {}]  }
   0x1   :  { %8 = vsyncpa [#allocation6], 0 }
   0x2   :  { %9 = vsyncpa [#allocation4], 0  ;;  %s287_s9 = smov [#allocation2]   ;;  %s288_s11 = smov [#allocation5]  }
   0x3   :  { %s16_s10 = sshll.u32 %s287_s9, 4  ;;  %s25_s12 = sshll.u32 %s288_s11, 4  ;;  %s17_s10 = int_to_ptr.vmem [resolvable:$true] %s16_s10  ;;  %s308_s12 = int_to_ptr.vmem [resolvable:$true] %s25_s12 }
   0x4   :  { %s215_s15 = scalar_lea.hbm %s351_s0, 128 }
   0x5   :  { %p216_p0 = scmp.ne.s32.totalorder %s351_s0, %s215_s15  ;;  %p219_p1 = scmp.lt.u32.totalorder %s215_s15, %s351_s0 }
   0x7   :  { %p221_p2 = pnand %p219_p1, %p216_p0 }
   0x9   :  { %224 = shalt.err (!%p221_p2)
}
   0xa   :  { %s225_s20 = scalar_lea.vmem %s17_s10, 128  ;;  %p230_p4 = scmp.lt.s32.totalorder %s17_s10, %s17_s10 }
   0xb   :  { %p226_p3 = scmp.ne.s32.totalorder %s17_s10, %s225_s20  ;;  %p231_p5 = scmp.lt.s32.totalorder %s225_s20, %s225_s20 }
   0xd   :  { %p232_p6 = por %p231_p5, %p230_p4 }
   0xf   :  { %p233_p7 = pnand %p232_p6, %p226_p3 }
  0x11   :  { %236 = shalt.err (!%p233_p7)
}
  0x12   :  { %19 = dma.hbm_to_vmem [thread:$0]  %s351_s0, 128, %s17_s10, [#allocation3]  }
  0x13   :  { %s237_s25 = scalar_lea.hbm %s352_s1, 4096 }
  0x14   :  { %p238_p8 = scmp.ne.s32.totalorder %s352_s1, %s237_s25  ;;  %p241_p9 = scmp.lt.u32.totalorder %s237_s25, %s352_s1 }
  0x16   :  { %p243_p10 = pnand %p241_p9, %p238_p8 }
  0x18   :  { %246 = shalt.err (!%p243_p10)
}
  0x19   :  { %s247_s30 = scalar_lea.vmem %s308_s12, 4096  ;;  %p252_p12 = scmp.lt.s32.totalorder %s308_s12, %s308_s12 }
  0x1a   :  { %p248_p11 = scmp.ne.s32.totalorder %s308_s12, %s247_s30  ;;  %p253_p13 = scmp.lt.s32.totalorder %s247_s30, %s247_s30 }
  0x1c   :  { %p254_p0 = por %p253_p13, %p252_p12 }
  0x1e   :  { %p255_p1 = pnand %p254_p0, %p248_p11 }
  0x20   :  { %258 = shalt.err (!%p255_p1)
}
  0x21   :  { %s289_s0 = smov 256   ;;  %s290_s3 = smov 16  }
  0x22   :  { %31 = dma.hbm_to_vmem [thread:$0]  %s352_s1, 4096, %s308_s12, [#allocation6], %s289_s0, %s289_s0, %s290_s3  }
  0x23   :  { %281 = dma.done.wait [#allocation3], 128  }
  0x24   :  { %282 = vsyncadd [#allocation3], 4294967168 }
  0x25   :  { %283 = dma.done.wait [#allocation6], 4096  }
  0x26   :  { %284 = vsyncadd [#allocation6], 4294963200  ;;  %v291_v0 = vmov 0.0   ;;  %v40_v1 = vld [vmem:[#allocation5 + $0x8] sm:$0xff]  ;;  %v42_v2 = vld [vmem:[#allocation5 + $0x18] sm:$0xff]  ;;  %s292_s1 = smov [#allocation7]  }
  0x27   :  { %135 = vmatprep.mubr.f32.mxu0 %v291_v0  ;;  %v39_v3 = vld [vmem:[#allocation5] sm:$0xff]  ;;  %v171_v4 = vpack.c.bf16 %v42_v2, %v40_v1  ;;  %v41_v5 = vld [vmem:[#allocation5 + $0x10] sm:$0xff]  ;;  %v44_v6 = vld [vmem:[#allocation5 + $0x28] sm:$0xff]  ;;  %s160_s6 = sshll.u32 %s292_s1, 4  ;;  %vm152_vm0 = vcmask 261120   ;;  %s161_s6 = int_to_ptr.vmem [resolvable:$true] %s160_s6 }
  0x28   :  { %v46_v7 = vld [vmem:[#allocation5 + $0x38] sm:$0xff]  ;;  %v173_v8 = vpack.c.bf16 %v41_v5, %v39_v3  ;;  %v43_v10 = vld [vmem:[#allocation5 + $0x20] sm:$0xff]  ;;  %v45_v11 = vld [vmem:[#allocation5 + $0x30] sm:$0xff]  ;;  %s259_s7 = scalar_lea.vmem %s161_s6, 128  ;;  %p264_p3 = scmp.lt.s32.totalorder %s161_s6, %s161_s6 }
  0x29   :  { %v175_v9 = vpack.c.bf16 %v46_v7, %v44_v6  ;;  %v48_v12 = vld [vmem:[#allocation5 + $0x48] sm:$0xff]  ;;  %172 = vmatprep.subr.bf16.mxu0 %v171_v4  ;;  %v50_v13 = vld [vmem:[#allocation5 + $0x58] sm:$0xff]  ;;  %v177_v14 = vpack.c.bf16 %v45_v11, %v43_v10  ;;  %v47_v16 = vld [vmem:[#allocation5 + $0x40] sm:$0xff]  ;;  %p260_p2 = scmp.ne.s32.totalorder %s161_s6, %s259_s7  ;;  %p265_p4 = scmp.lt.s32.totalorder %s259_s7, %s259_s7 }
  0x2a   :  { %174 = vmatpush1.bf16.msra.mxu0 %v173_v8  ;;  %v179_v15 = vpack.c.bf16 %v50_v13, %v48_v12  ;;  %v49_v17 = vld [vmem:[#allocation5 + $0x50] sm:$0xff]  ;;  %v52_v18 = vld [vmem:[#allocation5 + $0x68] sm:$0xff]  ;;  %v54_v19 = vld [vmem:[#allocation5 + $0x78] sm:$0xff] }
  0x2b   :  { %176 = vmatprep.subr.bf16.mxu0 %v175_v9  ;;  %v181_v20 = vpack.c.bf16 %v49_v17, %v47_v16  ;;  %v183_v21 = vpack.c.bf16 %v54_v19, %v52_v18  ;;  %v51_v22 = vld [vmem:[#allocation5 + $0x60] sm:$0xff]  ;;  %v53_v23 = vld [vmem:[#allocation5 + $0x70] sm:$0xff]  ;;  %v56_v24 = vld [vmem:[#allocation5 + $0x88] sm:$0xff]  ;;  %p266_p5 = por %p265_p4, %p264_p3 }
  0x2c   :  { %v58_v25 = vld [vmem:[#allocation5 + $0x98] sm:$0xff]  ;;  %v185_v26 = vpack.c.bf16 %v53_v23, %v51_v22  ;;  %v55_v28 = vld [vmem:[#allocation5 + $0x80] sm:$0xff]  ;;  %v57_v29 = vld [vmem:[#allocation5 + $0x90] sm:$0xff] }
  0x2d   :  { %v187_v27 = vpack.c.bf16 %v58_v25, %v56_v24  ;;  %v60_v30 = vld [vmem:[#allocation5 + $0xa8] sm:$0xff]  ;;  %v62_v31 = vld [vmem:[#allocation5 + $0xb8] sm:$0xff]  ;;  %v189_v32 = vpack.c.bf16 %v57_v29, %v55_v28  ;;  %v59_v34 = vld [vmem:[#allocation5 + $0xa0] sm:$0xff]  ;;  %p267_p6 = pnand %p266_p5, %p260_p2 }
  0x2e   :  { %178 = vmatpush1.bf16.msra.mxu0 %v177_v14  ;;  %v191_v33 = vpack.c.bf16 %v62_v31, %v60_v30  ;;  %v61_v35 = vld [vmem:[#allocation5 + $0xb0] sm:$0xff]  ;;  %v64_v36 = vld [vmem:[#allocation5 + $0xc8] sm:$0xff]  ;;  %v66_v37 = vld [vmem:[#allocation5 + $0xd8] sm:$0xff] }
  0x2f   :  { %180 = vmatprep.subr.bf16.mxu0 %v179_v15  ;;  %v193_v38 = vpack.c.bf16 %v61_v35, %v59_v34  ;;  %v195_v39 = vpack.c.bf16 %v66_v37, %v64_v36  ;;  %v63_v40 = vld [vmem:[#allocation5 + $0xc0] sm:$0xff]  ;;  %v65_v41 = vld [vmem:[#allocation5 + $0xd0] sm:$0xff]  ;;  %v68_v42 = vld [vmem:[#allocation5 + $0xe8] sm:$0xff] }
  0x30   :  { %v70_v43 = vld [vmem:[#allocation5 + $0xf8] sm:$0xff]  ;;  %v197_v44 = vpack.c.bf16 %v65_v41, %v63_v40  ;;  %v67_v46 = vld [vmem:[#allocation5 + $0xe0] sm:$0xff]  ;;  %v69_v47 = vld [vmem:[#allocation5 + $0xf0] sm:$0xff] }
  0x31   :  { %v199_v45 = vpack.c.bf16 %v70_v43, %v68_v42  ;;  %v201_v48 = vpack.c.bf16 %v69_v47, %v67_v46  ;;  %v38_v49 = vld [vmem:[#allocation2] sm:$0xff] }
  0x32   :  { %182 = vmatpush1.bf16.msra.mxu0 %v181_v20 }
  0x33   :  { %184 = vmatprep.subr.bf16.mxu0 %v183_v21 }
  0x36   :  { %186 = vmatpush1.bf16.msra.mxu0 %v185_v26 }
  0x37   :  { %188 = vmatprep.subr.bf16.mxu0 %v187_v27 }
  0x3a   :  { %190 = vmatpush1.bf16.msra.mxu0 %v189_v32 }
  0x3b   :  { %192 = vmatprep.subr.bf16.mxu0 %v191_v33 }
  0x3e   :  { %194 = vmatpush1.bf16.msra.mxu0 %v193_v38 }
  0x3f   :  { %196 = vmatprep.subr.bf16.mxu0 %v195_v39 }
  0x42   :  { %198 = vmatpush1.bf16.msra.mxu0 %v197_v44 }
  0x43   :  { %200 = vmatprep.subr.bf16.mxu0 %v199_v45 }
  0x46   :  { %202 = vmatpush1.bf16.msra.mxu0 %v201_v48 }
  0x49   :  { %136 = vmatmul.mubr.f32.vlgmr.msra.gmra.mrb[0].mxu0 %v38_v49 }
 0x11c   :  { %v137_v50 = vpop.f32.mrb[0].mxu0 }
 0x11d   :  { %v170_v51 = vmul.f32 -1.442695, %v137_v50  ;;  %v139_v52 = vpop.f32.mrb[1].mxu0 }
 0x11f   :  { %209 = vpow2.f32 %v170_v51 }
 0x120   :  { %211 = vtanh.f32 %v139_v52 }
 0x129   :  { %v210_v53 = vpop.eup %209 }
 0x12a   :  { %v145_v54 = vadd.f32 1.0, %v210_v53  ;;  %v212_v55 = vpop.eup %211 }
 0x12b   :  { %v149_v56 = vsub.f32 %v38_v49, %v212_v55 }
 0x12c   :  { %213 = vrcp.f32 %v145_v54 }
 0x136   :  { %v214_v57 = vpop.eup %213 }
 0x137   :  { %v150_v58 = vmul.f32 %v214_v57, %v149_v56 }
 0x139   :  { %v151_v59 = vadd.f32 %v212_v55, %v150_v58 }
 0x13b   :  { %153 = vst.msk [vmem:[#allocation7] sm:$0xff] %vm152_vm0, %v151_v59 }
 0x13c   :  { %270 = shalt.err (!%p267_p6)
}
 0x13d   :  { %s271_s10 = scalar_lea.hbm %s353_s2, 128 }
 0x13e   :  { %p272_p7 = scmp.ne.s32.totalorder %s353_s2, %s271_s10  ;;  %p275_p8 = scmp.lt.u32.totalorder %s271_s10, %s353_s2 }
 0x140   :  { %p277_p9 = pnand %p275_p8, %p272_p7 }
 0x142   :  { %280 = shalt.err (!%p277_p9)
}
 0x143   :  { %163 = dma.vmem_to_hbm [thread:$0]  %s161_s6, 128, %s353_s2, [#allocation4]  }
 0x144   :  { %285 = dma.done.wait [#allocation4], 128  }
 0x145   :  { %286 = vsyncadd [#allocation4], 4294967168 }
 0x146   :  { %167 = vsyncpa [#allocation3], 1 }
 0x147   :  { %168 = vsyncpa [#allocation6], 1 }
 0x148   :  { %169 = vsyncpa [#allocation4], 1 }

</bundles_post_ra>
